<compile_context>
chip_gen: v7x
topology: tpu7x:2x2x1
jax: 0.10.0
libtpu: 0.0.40
codegen_flags: <defaults>
</compile_context>

<pallas_src>
import jax
import jax.numpy as jnp
from jax.experimental import pallas as pl
from jax.experimental.pallas import tpu as pltpu

LANE = 128          # TPU lane width; all feature dims are padded to this.
_P_ROWS = 2 * LANE + 8  # slab rows: w1 (128) + w2 (128) + bias block (8)


def actor_forward_kernel(x_ref, p_ref, o_ref):
    """x_ref: (TB, 128) padded states; p_ref: (264, 128) packed params;
       o_ref: (TB, 128) padded output."""
    x = x_ref[...]
    w1 = p_ref[0:LANE, :]                 # (128, 128)  rows >= state_dim are 0
    w2 = p_ref[LANE:2 * LANE, :]          # (128, 128)  rows/cols >= H are 0
    b1 = p_ref[2 * LANE:2 * LANE + 1, :]  # (1, 128)    lanes >= H are 0
    b2 = p_ref[2 * LANE + 1:2 * LANE + 2, :]

    h = jnp.tanh(jnp.dot(x, w1, preferred_element_type=jnp.float32) + b1)
    o = jnp.tanh(jnp.dot(h, w2, preferred_element_type=jnp.float32) + b2)
    o_ref[...] = o.astype(o_ref.dtype)


def pack_params(w1_t, b1, w2_t, b2):
    """Pack layer params into one lane-dense f32 slab (2*128+8, 128).

    w1_t: [state_dim, H], b1: [1, H], w2_t: [H, H], b2: [1, H].
    Zero padding in unused rows/cols keeps the padded math exact
    (tanh(0 + 0) = 0 in padded lanes, which are sliced away anyway).
    """
    d, h = w1_t.shape
    slab = jnp.zeros((_P_ROWS, LANE), jnp.float32)
    slab = slab.at[:d, :h].set(w1_t.astype(jnp.float32))
    slab = slab.at[LANE:LANE + h, :h].set(w2_t.astype(jnp.float32))
    slab = slab.at[2 * LANE, :h].set(b1.reshape(-1).astype(jnp.float32))
    slab = slab.at[2 * LANE + 1, :h].set(b2.reshape(-1).astype(jnp.float32))
    return slab


def actor_forward(state, params_slab, hidden_dim, *, tile_b=512):
    """state: [B, state_dim] f32; params_slab: pack_params(...) -> [B, hidden_dim]."""
    B, D = state.shape
    assert D <= LANE and hidden_dim <= LANE

    # Pad batch to a multiple of 8 (sublane granularity), pick a batch tile.
    Bp = ((B + 7) // 8) * 8
    if Bp >= tile_b and Bp % tile_b == 0:
        TB = tile_b
    else:
        TB = Bp
    grid = (pl.cdiv(Bp, TB),)

    # Pad state to (Bp, 128) lanes so both the load and the matmul are lane-dense.
    x = jnp.zeros((Bp, LANE), jnp.float32).at[:B, :D].set(state.astype(jnp.float32))

    out_padded = pl.pallas_call(
        actor_forward_kernel,
        out_shape=jax.ShapeDtypeStruct((Bp, LANE), jnp.float32),
        grid=grid,
        in_specs=[
            # state tile walks the batch axis
            pl.BlockSpec((TB, LANE), lambda i: (i, 0)),
            # params slab stays resident (constant index_map -> single DMA)
            pl.BlockSpec((_P_ROWS, LANE), lambda i: (0, 0)),
        ],
        out_specs=pl.BlockSpec((TB, LANE), lambda i: (i, 0)),
        compiler_params=pltpu.CompilerParams(
            dimension_semantics=("parallel",),  # v7x: split batch across the 2 TCs
        ),
    )(x, params_slab)

    return out_padded[:B, :hidden_dim]


def init_linear_params(key, in_dim, out_dim):
    """PyTorch nn.Linear-style init: U(-1/sqrt(in_dim), 1/sqrt(in_dim)).
    Returns weight already transposed to [in_dim, out_dim] and bias [1, out_dim]."""
    kw, kb = jax.random.split(key)
    bound = 1.0 / (in_dim ** 0.5)
    w_t = jax.random.uniform(kw, (in_dim, out_dim), jnp.float32, -bound, bound)
    b = jax.random.uniform(kb, (1, out_dim), jnp.float32, -bound, bound)
    return w_t, b


if __name__ == "__main__":
    # Small shapes consistent with the module: state_dim=16, hidden_dim=32, batch=8.
    batch, state_dim, action_dim, hidden_dim = 8, 16, 4, 32

    key = jax.random.PRNGKey(0)
    k_state, k1, k2, k3 = jax.random.split(key, 4)

    state = jax.random.normal(k_state, (batch, state_dim), jnp.float32)

    w1_t, b1 = init_linear_params(k1, state_dim, hidden_dim)   # l1
    w2_t, b2 = init_linear_params(k2, hidden_dim, hidden_dim)  # l2
    # l3 exists in the module but forward() does not use it (only .pi() does).
    _w3_t, _b3 = init_linear_params(k3, hidden_dim, action_dim)

    params_slab = pack_params(w1_t, b1, w2_t, b2)

    out = actor_forward(state, params_slab, hidden_dim)
    out = jax.block_until_ready(out)

    # Reference check in plain JAX.
    ref = jnp.tanh(jnp.tanh(state @ w1_t + b1) @ w2_t + b2)
    assert out.shape == (batch, hidden_dim)
    assert jnp.allclose(out, ref, atol=1e-5, rtol=1e-5)

    print("KERNEL_OK")
</pallas_src>

<mosaic_0001>
module attributes {stable_mosaic.version = 11 : i64} {
  func.func @actor_forward_kernel(%arg0: i32, %arg1: memref<8x128xf32, #tpu.memory_space<vmem>>, %arg2: memref<264x128xf32, #tpu.memory_space<vmem>>, %arg3: memref<8x128xf32, #tpu.memory_space<vmem>>) attributes {dimension_semantics = [#tpu.dimension_semantics<parallel>], iteration_bounds = array<i64: 1>, scalar_prefetch = 0 : i64, scratch_operands = 0 : i64, tpu.core_type = #tpu.core_type<tc>, window_params = [{transform_indices = @transform_0, window_bounds = array<i64: 8, 128>}, {pipeline_mode = #tpu.pipeline_mode<synchronous>, transform_indices = @transform_1, window_bounds = array<i64: 264, 128>}, {transform_indices = @transform_2, window_bounds = array<i64: 8, 128>}]} {
    %c0 = arith.constant 0 : index
    %c0_0 = arith.constant 0 : index
    %0 = vector.load %arg1[%c0, %c0_0] : memref<8x128xf32, #tpu.memory_space<vmem>>, vector<8x128xf32>
    %c0_1 = arith.constant 0 : index
    %c0_2 = arith.constant 0 : index
    %1 = vector.load %arg2[%c0_1, %c0_2] : memref<264x128xf32, #tpu.memory_space<vmem>>, vector<128x128xf32>
    %c128 = arith.constant 128 : index
    %c0_3 = arith.constant 0 : index
    %2 = vector.load %arg2[%c128, %c0_3] : memref<264x128xf32, #tpu.memory_space<vmem>>, vector<128x128xf32>
    %c256 = arith.constant 256 : index
    %c0_4 = arith.constant 0 : index
    %3 = vector.load %arg2[%c256, %c0_4] : memref<264x128xf32, #tpu.memory_space<vmem>>, vector<1x128xf32>
    %c257 = arith.constant 257 : index
    %c0_5 = arith.constant 0 : index
    %4 = vector.load %arg2[%c257, %c0_5] : memref<264x128xf32, #tpu.memory_space<vmem>>, vector<1x128xf32>
    %cst = arith.constant dense<0.000000e+00> : vector<8x128xf32>
    %5 = tpu.matmul %0, %1, %cst {dimension_numbers = #tpu.dot_dimension_numbers<[1], [0], [0], [1], [0, 0, 1, 1], [], []>} : vector<8x128xf32>, vector<128x128xf32>, vector<8x128xf32> -> vector<8x128xf32>
    %6 = vector.broadcast %3 : vector<1x128xf32> to vector<8x128xf32>
    %7 = arith.addf %5, %6 : vector<8x128xf32>
    %8 = math.tanh %7 : vector<8x128xf32>
    %cst_6 = arith.constant dense<0.000000e+00> : vector<8x128xf32>
    %9 = tpu.matmul %8, %2, %cst_6 {dimension_numbers = #tpu.dot_dimension_numbers<[1], [0], [0], [1], [0, 0, 1, 1], [], []>} : vector<8x128xf32>, vector<128x128xf32>, vector<8x128xf32> -> vector<8x128xf32>
    %10 = vector.broadcast %4 : vector<1x128xf32> to vector<8x128xf32>
    %11 = arith.addf %9, %10 : vector<8x128xf32>
    %12 = math.tanh %11 : vector<8x128xf32>
    %c0_7 = arith.constant 0 : index
    %c0_8 = arith.constant 0 : index
    %13 = vector.load %arg3[%c0_7, %c0_8] : memref<8x128xf32, #tpu.memory_space<vmem>>, vector<8x128xf32>
    tpu.vector_store %arg3[%c0_7, %c0_8], %12 {strides = array<i32>} : memref<8x128xf32, #tpu.memory_space<vmem>>, vector<8x128xf32>,
    return
  }
  func.func @transform_0(%arg0: i32) -> (i32, i32) {
    %c0_i32 = arith.constant 0 : i32
    %c0_i32_0 = arith.constant 0 : i32
    return %arg0, %c0_i32 : i32, i32
  }
  func.func @transform_1(%arg0: i32) -> (i32, i32) {
    %c0_i32 = arith.constant 0 : i32
    %c0_i32_0 = arith.constant 0 : i32
    %c0_i32_1 = arith.constant 0 : i32
    return %c0_i32, %c0_i32_0 : i32, i32
  }
  func.func @transform_2(%arg0: i32) -> (i32, i32) {
    %c0_i32 = arith.constant 0 : i32
    %c0_i32_0 = arith.constant 0 : i32
    return %arg0, %c0_i32 : i32, i32
  }
}

</mosaic_0001>

<bundles_post_ra>
// kernel: tpu_custom_call.1
= control target key start
LH: loop header
LB: loop body
LE: loop exit
PB: predicated region body
PF: predicated region fallthrough
CT: control target
= control target key end

     0   :  { %7 = vsyncpa [#allocation3], 0  ;;  %s560_s0 = inlined_call_operand.hbm [shape: f32[8,128], index: 0, kind: input, shape index: {}]   ;;  %s561_s1 = inlined_call_operand.hbm [shape: f32[264,128], index: 1, kind: input, shape index: {}]   ;;  %s562_s2 = inlined_call_operand.hbm [shape: f32[8,128], index: 2, kind: output, shape index: {}]  }
   0x1   :  { %8 = vsyncpa [#allocation6], 0 }
   0x2   :  { %9 = vsyncpa [#allocation4], 0  ;;  %s478_s9 = smov [#allocation2]   ;;  %s479_s11 = smov [#allocation5]  }
   0x3   :  { %s16_s10 = sshll.u32 %s478_s9, 4  ;;  %s25_s12 = sshll.u32 %s479_s11, 4  ;;  %s17_s10 = int_to_ptr.vmem [resolvable:$true] %s16_s10  ;;  %s501_s12 = int_to_ptr.vmem [resolvable:$true] %s25_s12 }
   0x4   :  { %s406_s15 = scalar_lea.hbm %s560_s0, 128 }
   0x5   :  { %p407_p0 = scmp.ne.s32.totalorder %s560_s0, %s406_s15  ;;  %p410_p1 = scmp.lt.u32.totalorder %s406_s15, %s560_s0 }
   0x7   :  { %p412_p2 = pnand %p410_p1, %p407_p0 }
   0x9   :  { %415 = shalt.err (!%p412_p2)
}
   0xa   :  { %s416_s20 = scalar_lea.vmem %s17_s10, 128  ;;  %p421_p4 = scmp.lt.s32.totalorder %s17_s10, %s17_s10 }
   0xb   :  { %p417_p3 = scmp.ne.s32.totalorder %s17_s10, %s416_s20  ;;  %p422_p5 = scmp.lt.s32.totalorder %s416_s20, %s416_s20 }
   0xd   :  { %p423_p6 = por %p422_p5, %p421_p4 }
   0xf   :  { %p424_p7 = pnand %p423_p6, %p417_p3 }
  0x11   :  { %427 = shalt.err (!%p424_p7)
}
  0x12   :  { %19 = dma.hbm_to_vmem [thread:$0]  %s560_s0, 128, %s17_s10, [#allocation3]  }
  0x13   :  { %s428_s25 = scalar_lea.hbm %s561_s1, 4224 }
  0x14   :  { %p429_p8 = scmp.ne.s32.totalorder %s561_s1, %s428_s25  ;;  %p432_p9 = scmp.lt.u32.totalorder %s428_s25, %s561_s1 }
  0x16   :  { %p434_p10 = pnand %p432_p9, %p429_p8 }
  0x18   :  { %437 = shalt.err (!%p434_p10)
}
  0x19   :  { %s438_s30 = scalar_lea.vmem %s501_s12, 4224  ;;  %p443_p12 = scmp.lt.s32.totalorder %s501_s12, %s501_s12 }
  0x1a   :  { %p439_p11 = scmp.ne.s32.totalorder %s501_s12, %s438_s30  ;;  %p444_p13 = scmp.lt.s32.totalorder %s438_s30, %s438_s30 }
  0x1c   :  { %p445_p0 = por %p444_p13, %p443_p12 }
  0x1e   :  { %p446_p1 = pnand %p445_p0, %p439_p11 }
  0x20   :  { %449 = shalt.err (!%p446_p1)
}
  0x21   :  { %s480_s0 = smov 128   ;;  %s481_s3 = smov 8  }
  0x22   :  { %31 = dma.hbm_to_vmem [thread:$0]  %s561_s1, 4224, %s501_s12, [#allocation6], %s480_s0, %s480_s0, %s481_s3  }
  0x23   :  { %472 = dma.done.wait [#allocation3], 128  }
  0x24   :  { %473 = vsyncadd [#allocation3], 4294967168 }
  0x25   :  { %474 = dma.done.wait [#allocation6], 4224  }
  0x26   :  { %475 = vsyncadd [#allocation6], 4294963072  ;;  %v482_v0 = vmov 0.0|0.0   ;;  %vm483_vm0 = vmmov 0   ;;  %v484_v1 = vmov 0.0   ;;  %v39_v2 = vld [vmem:[#allocation5] sm:$0xff] }
  0x27   :  { %346 = vmatprep.subr.bf16.mxu0 %v482_v0  ;;  %308 = vmatprep.mubr.msk.f32.mxu0 %vm483_vm0, %v484_v1  ;;  %v40_v3 = vld [vmem:[#allocation5 + $0x8] sm:$0xff]  ;;  %v41_v4 = vld [vmem:[#allocation5 + $0x10] sm:$0xff]  ;;  %v42_v6 = vld [vmem:[#allocation5 + $0x18] sm:$0xff]  ;;  %s485_s1 = smov [#allocation7]  }
  0x28   :  { %370 = vmatprep.subr.bf16.mxu1 %v482_v0  ;;  %343 = vmatprep.mubr.msk.f32.mxu1 %vm483_vm0, %v484_v1  ;;  %v347_v5 = vpack.c.bf16 %v40_v3, %v39_v2  ;;  %v350_v7 = vpack.c.bf16 %v42_v6, %v41_v4  ;;  %v43_v8 = vld [vmem:[#allocation5 + $0x20] sm:$0xff]  ;;  %v44_v9 = vld [vmem:[#allocation5 + $0x28] sm:$0xff]  ;;  %v57_v12 = vld [vmem:[#allocation5 + $0x90] sm:$0xff]  ;;  %s230_s6 = sshll.u32 %s485_s1, 4  ;;  %s231_s6 = int_to_ptr.vmem [resolvable:$true] %s230_s6 }
  0x29   :  { %v55_v10 = vld [vmem:[#allocation5 + $0x80] sm:$0xff]  ;;  %v56_v11 = vld [vmem:[#allocation5 + $0x88] sm:$0xff]  ;;  %v58_v13 = vld [vmem:[#allocation5 + $0x98] sm:$0xff]  ;;  %v353_v14 = vpack.c.bf16 %v44_v9, %v43_v8  ;;  %s450_s7 = scalar_lea.vmem %s231_s6, 128  ;;  %p455_p3 = scmp.lt.s32.totalorder %s231_s6, %s231_s6 }
  0x2a   :  { %348 = vmatpush3.bf16.msra.mxu0 %v347_v5  ;;  %v371_v15 = vpack.c.bf16 %v56_v11, %v55_v10  ;;  %v45_v16 = vld [vmem:[#allocation5 + $0x30] sm:$0xff]  ;;  %v46_v17 = vld [vmem:[#allocation5 + $0x38] sm:$0xff]  ;;  %v374_v18 = vpack.c.bf16 %v58_v13, %v57_v12  ;;  %v59_v19 = vld [vmem:[#allocation5 + $0xa0] sm:$0xff]  ;;  %p451_p2 = scmp.ne.s32.totalorder %s231_s6, %s450_s7  ;;  %p456_p4 = scmp.lt.s32.totalorder %s450_s7, %s450_s7 }
  0x2b   :  { %349 = vmatprep.subr.bf16.mxu0 %v482_v0  ;;  %v60_v20 = vld [vmem:[#allocation5 + $0xa8] sm:$0xff]  ;;  %v356_v21 = vpack.c.bf16 %v46_v17, %v45_v16  ;;  %v47_v22 = vld [vmem:[#allocation5 + $0x40] sm:$0xff]  ;;  %v61_v25 = vld [vmem:[#allocation5 + $0xb0] sm:$0xff] }
  0x2c   :  { %372 = vmatpush3.bf16.msra.mxu1 %v371_v15  ;;  %v48_v23 = vld [vmem:[#allocation5 + $0x48] sm:$0xff]  ;;  %v377_v24 = vpack.c.bf16 %v60_v20, %v59_v19  ;;  %v62_v26 = vld [vmem:[#allocation5 + $0xb8] sm:$0xff]  ;;  %v49_v28 = vld [vmem:[#allocation5 + $0x50] sm:$0xff]  ;;  %p457_p5 = por %p456_p4, %p455_p3 }
  0x2d   :  { %373 = vmatprep.subr.bf16.mxu1 %v482_v0  ;;  %v359_v27 = vpack.c.bf16 %v48_v23, %v47_v22  ;;  %v50_v29 = vld [vmem:[#allocation5 + $0x58] sm:$0xff]  ;;  %v380_v30 = vpack.c.bf16 %v62_v26, %v61_v25  ;;  %v63_v31 = vld [vmem:[#allocation5 + $0xc0] sm:$0xff]  ;;  %v64_v32 = vld [vmem:[#allocation5 + $0xc8] sm:$0xff] }
  0x2e   :  { %351 = vmatpush3.bf16.msra.mxu0 %v350_v7  ;;  %v362_v33 = vpack.c.bf16 %v50_v29, %v49_v28  ;;  %v51_v34 = vld [vmem:[#allocation5 + $0x60] sm:$0xff]  ;;  %v52_v35 = vld [vmem:[#allocation5 + $0x68] sm:$0xff]  ;;  %v383_v36 = vpack.c.bf16 %v64_v32, %v63_v31  ;;  %v53_v38 = vld [vmem:[#allocation5 + $0x70] sm:$0xff]  ;;  %p458_p6 = pnand %p457_p5, %p451_p2 }
  0x2f   :  { %352 = vmatprep.subr.bf16.mxu0 %v482_v0  ;;  %v365_v37 = vpack.c.bf16 %v52_v35, %v51_v34  ;;  %v54_v39 = vld [vmem:[#allocation5 + $0x78] sm:$0xff]  ;;  %v65_v42 = vld [vmem:[#allocation5 + $0xd0] sm:$0xff]  ;;  %v67_v45 = vld [vmem:[#allocation5 + $0xe0] sm:$0xff] }
  0x30   :  { %375 = vmatpush3.bf16.msra.mxu1 %v374_v18  ;;  %v368_v40 = vpack.c.bf16 %v54_v39, %v53_v38  ;;  %v38_v41 = vld [vmem:[#allocation2] sm:$0xff]  ;;  %v68_v46 = vld [vmem:[#allocation5 + $0xe8] sm:$0xff]  ;;  %v69_v48 = vld [vmem:[#allocation5 + $0xf0] sm:$0xff] }
  0x31   :  { %376 = vmatprep.subr.bf16.mxu1 %v482_v0  ;;  %v66_v43 = vld [vmem:[#allocation5 + $0xd8] sm:$0xff]  ;;  %v389_v47 = vpack.c.bf16 %v68_v46, %v67_v45  ;;  %v240_v51 = vld [vmem:[#allocation5 + $0x100] ss:$0 sm:$0xff]  ;;  %v241_v56 = vld [vmem:[#allocation5 + $0x101] ss:$0 sm:$0xff] }
  0x32   :  { %354 = vmatpush3.bf16.msra.mxu0 %v353_v14  ;;  %v386_v44 = vpack.c.bf16 %v66_v43, %v65_v42  ;;  %v70_v49 = vld [vmem:[#allocation5 + $0xf8] sm:$0xff] }
  0x33   :  { %355 = vmatprep.subr.bf16.mxu0 %v482_v0  ;;  %v392_v50 = vpack.c.bf16 %v70_v49, %v69_v48 }
  0x34   :  { %378 = vmatpush3.bf16.msra.mxu1 %v377_v24 }
  0x35   :  { %379 = vmatprep.subr.bf16.mxu1 %v482_v0 }
  0x36   :  { %357 = vmatpush3.bf16.msra.mxu0 %v356_v21 }
  0x37   :  { %358 = vmatprep.subr.bf16.mxu0 %v482_v0 }
  0x38   :  { %381 = vmatpush3.bf16.msra.mxu1 %v380_v30 }
  0x39   :  { %382 = vmatprep.subr.bf16.mxu1 %v482_v0 }
  0x3a   :  { %360 = vmatpush3.bf16.msra.mxu0 %v359_v27 }
  0x3b   :  { %361 = vmatprep.subr.bf16.mxu0 %v482_v0 }
  0x3c   :  { %384 = vmatpush3.bf16.msra.mxu1 %v383_v36 }
  0x3d   :  { %385 = vmatprep.subr.bf16.mxu1 %v482_v0 }
  0x3e   :  { %363 = vmatpush3.bf16.msra.mxu0 %v362_v33 }
  0x3f   :  { %364 = vmatprep.subr.bf16.mxu0 %v482_v0 }
  0x40   :  { %387 = vmatpush3.bf16.msra.mxu1 %v386_v44 }
  0x41   :  { %388 = vmatprep.subr.bf16.mxu1 %v482_v0 }
  0x42   :  { %366 = vmatpush3.bf16.msra.mxu0 %v365_v37 }
  0x43   :  { %367 = vmatprep.subr.bf16.mxu0 %v482_v0 }
  0x44   :  { %390 = vmatpush3.bf16.msra.mxu1 %v389_v47 }
  0x45   :  { %391 = vmatprep.subr.bf16.mxu1 %v482_v0 }
  0x46   :  { %369 = vmatpush3.bf16.msra.mxu0 %v368_v40 }
  0x48   :  { %393 = vmatpush3.bf16.msra.mxu1 %v392_v50 }
  0x49   :  { %309 = vmatmul.mubr.f32.vlgmr.msra.gmra.mrb[0].mxu0 %v38_v41 }
 0x11c   :  { %v143_v52 = vpop.f32.mrb[0].mxu0 }
 0x11d   :  { %v144_v53 = vadd.f32 %v240_v51, %v143_v52  ;;  %v310_v54 = vpop.f32.mrb[1].mxu0 }
 0x11f   :  { %402 = vtanh.f32 %v144_v53 }
 0x129   :  { %v403_v55 = vpop.eup %402 }
 0x12a   :  { %344 = vmatmul.mubr.f32.vlgmr.msra.gmra.mrb[0].mxu1 %v403_v55 }
 0x1fd   :  { %v218_v57 = vpop.f32.mrb[0].mxu1 }
 0x1fe   :  { %v219_v58 = vadd.f32 %v241_v56, %v218_v57  ;;  %v345_v59 = vpop.f32.mrb[1].mxu1 }
 0x200   :  { %404 = vtanh.f32 %v219_v58 }
 0x20a   :  { %v405_v60 = vpop.eup %404 }
 0x20b   :  { %223 = vst [vmem:[#allocation7] sm:$0xff] %v405_v60 }
 0x20c   :  { %461 = shalt.err (!%p458_p6)
}
 0x20d   :  { %s462_s10 = scalar_lea.hbm %s562_s2, 128 }
 0x20e   :  { %p463_p7 = scmp.ne.s32.totalorder %s562_s2, %s462_s10  ;;  %p466_p8 = scmp.lt.u32.totalorder %s462_s10, %s562_s2 }
 0x210   :  { %p468_p9 = pnand %p466_p8, %p463_p7 }
 0x212   :  { %471 = shalt.err (!%p468_p9)
}
 0x213   :  { %233 = dma.vmem_to_hbm [thread:$0]  %s231_s6, 128, %s562_s2, [#allocation4]  }
 0x214   :  { %476 = dma.done.wait [#allocation4], 128  }
 0x215   :  { %477 = vsyncadd [#allocation4], 4294967168 }
 0x216   :  { %237 = vsyncpa [#allocation3], 1 }
 0x217   :  { %238 = vsyncpa [#allocation6], 1 }
 0x218   :  { %239 = vsyncpa [#allocation4], 1 }

</bundles_post_ra>
